<compile_context>
chip_gen: v7x
topology: tpu7x:2x2x1
jax: 0.10.0
libtpu: 0.0.40
codegen_flags: <defaults>
</compile_context>

<pallas_src>
import jax
import jax.numpy as jnp
import numpy as np
from jax.experimental import pallas as pl
from jax.experimental.pallas import tpu as pltpu


def image_encoder_kernel(xg_ref, xv_ref, wg_ref, bg_ref, wv_ref, bv_ref,
                         g_ref, v_ref):
    """Both affine+ReLU paths of ImageEncoder.forward in one VMEM-resident body.

    xg_ref: (B, D1*D2*D3)   bf16  flattened x (AvgPool2d folded into wg)
    xv_ref: (B*pixels, D3)  bf16  per-pixel rows of x
    wg_ref: (D1*D2*D3, emb) bf16  pool-folded global_affine weight (transposed)
    bg_ref: (1, emb)        f32
    wv_ref: (D3, hid)       bf16  v_affine weight (transposed)
    bv_ref: (1, hid)        f32
    g_ref : (B, emb)        f32
    v_ref : (B*pixels, hid) f32
    """
    # Global path: bf16 MXU matmul, f32 accumulate, f32 bias + ReLU epilogue.
    g = jnp.dot(xg_ref[...], wg_ref[...],
                preferred_element_type=jnp.float32) + bg_ref[...]
    g_ref[...] = jnp.maximum(g, 0.0).astype(g_ref.dtype)

    # Per-pixel path: batch folded into rows.
    v = jnp.dot(xv_ref[...], wv_ref[...],
                preferred_element_type=jnp.float32) + bv_ref[...]
    v_ref[...] = jnp.maximum(v, 0.0).astype(v_ref.dtype)

    # TODO(synk): Dropout (v_dr, g_dr) is eval-mode identity here; training-mode
    # parity with torch's RNG stream is not implemented (would need
    # pltpu.prng_seed / pltpu.prng_random_bits).


def prepare_image_encoder_params(params, x_shape, pool_k):
    """One-time weight prep (hoisted out of the per-call path).

    Folds AvgPool2d(pool_k) (floor mode, matching PyTorch defaults) into the
    global affine weight and stores both weights in bf16 (biases stay f32).
    """
    _, d1, d2, d3 = x_shape
    oh, ow = d2 // pool_k, d3 // pool_k
    g_w, g_b, v_w, v_b = params["g_w"], params["g_b"], params["v_w"], params["v_b"]
    emb, hid = g_w.shape[0], v_w.shape[0]
    assert g_w.shape[1] == d1 * oh * ow, "global_affine in_features mismatch"
    assert v_w.shape[1] == d3, "v_affine in_features mismatch"

    # wexp[(c*D2 + h)*D3 + w, e] = g_w.T[(c*OH + h//K)*OW + w//K, e] / K^2,
    # zero outside the truncated pooling footprint (AvgPool2d ceil_mode=False).
    wgT = g_w.T.astype(jnp.float32)                                   # (d1*oh*ow, emb)
    w4 = wgT.reshape(d1, oh, ow, emb) / float(pool_k * pool_k)
    w6 = jnp.broadcast_to(w4[:, :, None, :, None, :],
                          (d1, oh, pool_k, ow, pool_k, emb))
    wexp = w6.reshape(d1, oh * pool_k, ow * pool_k, emb)
    wexp = jnp.pad(wexp, ((0, 0), (0, d2 - oh * pool_k),
                          (0, d3 - ow * pool_k), (0, 0)))
    wexp = wexp.reshape(d1 * d2 * d3, emb)

    return dict(
        wg=wexp.astype(jnp.bfloat16),                   # (D1*D2*D3, emb) bf16
        bg=g_b.reshape(1, emb).astype(jnp.float32),     # (1, emb)        f32
        wv=v_w.T.astype(jnp.bfloat16),                  # (D3, hid)       bf16
        bv=v_b.reshape(1, hid).astype(jnp.float32),     # (1, hid)        f32
    )


@jax.jit
def image_encoder_forward(x, prep):
    B, d1, d2, d3 = x.shape
    pixels = d1 * d2
    rows = B * pixels
    kg = d1 * d2 * d3

    wg, bg, wv, bv = prep["wg"], prep["bg"], prep["wv"], prep["bv"]
    emb, hid = wg.shape[1], wv.shape[1]

    xb = x.astype(jnp.bfloat16)      # bf16 feed: halves activation DMA, MXU-native
    xg = xb.reshape(B, kg)           # contraction layout of the pool-folded affine
    xv = xb.reshape(rows, d3)        # per-pixel rows (second view of the same bytes)
    # NOTE: xg/xv alias the same bf16 buffer; the duplicate VMEM copy is a few KiB
    # here.  At scale, pass x once and tile rows / kg on a grid instead.

    cost = pl.CostEstimate(
        flops=2 * B * kg * emb + 2 * rows * d3 * hid,
        transcendentals=0,
        bytes_accessed=(xg.size + xv.size + wg.size + wv.size) * 2
                       + (bg.size + bv.size) * 4
                       + (B * emb + rows * hid) * 4,
    )

    g, v = pl.pallas_call(
        image_encoder_kernel,
        out_shape=(jax.ShapeDtypeStruct((B, emb), jnp.float32),
                   jax.ShapeDtypeStruct((rows, hid), jnp.float32)),
        in_specs=[pl.BlockSpec(memory_space=pltpu.MemorySpace.VMEM)] * 6,
        out_specs=(pl.BlockSpec(memory_space=pltpu.MemorySpace.VMEM),
                   pl.BlockSpec(memory_space=pltpu.MemorySpace.VMEM)),
        cost_estimate=cost,
    )(xg, xv, wg, bg, wv, bv)

    return g, v.reshape(B, pixels, hid)


if __name__ == "__main__":
    # Module config: input_shape = (4, 4, 16), hidden_size=32, embedding_size=32
    B, D1, D2, D3 = 2, 4, 4, 16
    hidden_size, embedding_size = 32, 32
    pool_k = 4                        # nn.AvgPool2d(input_shape[0])

    key = jax.random.PRNGKey(0)
    kx, kgw, kgb, kvw, kvb = jax.random.split(key, 5)
    x = jax.random.normal(kx, (B, D1, D2, D3), jnp.float32)
    # nn.Linear params: weight (out_features, in_features), bias (out_features,)
    g_w = jax.random.normal(kgw, (embedding_size, D3), jnp.float32) / jnp.sqrt(D3)
    g_b = jax.random.normal(kgb, (embedding_size,), jnp.float32) * 0.1
    v_w = jax.random.normal(kvw, (hidden_size, D3), jnp.float32) / jnp.sqrt(D3)
    v_b = jax.random.normal(kvb, (hidden_size,), jnp.float32) * 0.1
    params = dict(g_w=g_w, g_b=g_b, v_w=v_w, v_b=v_b)

    prep = prepare_image_encoder_params(params, x.shape, pool_k)
    g_out, v_out = image_encoder_forward(x, prep)
    jax.block_until_ready((g_out, v_out))
    g_np, v_np = np.asarray(g_out), np.asarray(v_out)

    # ---- references of the PyTorch forward (eval mode), computed in numpy ----
    OH, OW = D2 // pool_k, D3 // pool_k

    def reference(x_in, gw_in, vw_in):
        x64 = np.asarray(x_in, np.float64)
        gw64 = np.asarray(gw_in, np.float64)
        vw64 = np.asarray(vw_in, np.float64)
        gb64 = np.asarray(g_b, np.float64)
        vb64 = np.asarray(v_b, np.float64)
        xr = x64[:, :, :OH * pool_k, :OW * pool_k].reshape(
            B, D1, OH, pool_k, OW, pool_k)
        pooled = xr.mean(axis=(3, 5)).reshape(B, -1)
        g_ref = np.maximum(pooled @ gw64.T + gb64, 0.0)
        v_ref = np.maximum(
            x64.reshape(B, D1 * D2, D3) @ vw64.T + vb64, 0.0)
        return g_ref, v_ref

    # (a) bf16-consistent reference: same operand rounding the kernel consumes.
    x_bf = np.asarray(x.astype(jnp.bfloat16).astype(jnp.float32))
    gw_bf = np.asarray(jnp.asarray(g_w).astype(jnp.bfloat16).astype(jnp.float32))
    vw_bf = np.asarray(jnp.asarray(v_w).astype(jnp.bfloat16).astype(jnp.float32))
    g_ref_bf, v_ref_bf = reference(x_bf, gw_bf, vw_bf)
    assert np.allclose(g_np, g_ref_bf, atol=2e-3), "global mismatch (bf16 ref)"
    assert np.allclose(v_np, v_ref_bf, atol=2e-3), "inputs mismatch (bf16 ref)"

    # (b) full-f32 module reference (semantic fidelity within bf16 rounding).
    g_ref_f32, v_ref_f32 = reference(np.asarray(x), np.asarray(g_w), np.asarray(v_w))
    assert np.allclose(g_np, g_ref_f32, atol=5e-2), "global mismatch (f32 ref)"
    assert np.allclose(v_np, v_ref_f32, atol=5e-2), "inputs mismatch (f32 ref)"

    print("KERNEL_OK")
</pallas_src>

<mosaic_0001>
module attributes {stable_mosaic.version = 11 : i64} {
  func.func @image_encoder_kernel(%arg0: memref<2x256xbf16, #tpu.memory_space<vmem>>, %arg1: memref<32x16xbf16, #tpu.memory_space<vmem>>, %arg2: memref<256x32xbf16, #tpu.memory_space<vmem>>, %arg3: memref<1x32xf32, #tpu.memory_space<vmem>>, %arg4: memref<16x32xbf16, #tpu.memory_space<vmem>>, %arg5: memref<1x32xf32, #tpu.memory_space<vmem>>, %arg6: memref<2x32xf32, #tpu.memory_space<vmem>>, %arg7: memref<32x32xf32, #tpu.memory_space<vmem>>) attributes {dimension_semantics = [], scalar_prefetch = 0 : i64, scratch_operands = 0 : i64, tpu.core_type = #tpu.core_type<tc>} {
    %c0 = arith.constant 0 : index
    %c0_0 = arith.constant 0 : index
    %0 = vector.load %arg0[%c0, %c0_0] : memref<2x256xbf16, #tpu.memory_space<vmem>>, vector<2x256xbf16>
    %c0_1 = arith.constant 0 : index
    %c0_2 = arith.constant 0 : index
    %1 = vector.load %arg2[%c0_1, %c0_2] : memref<256x32xbf16, #tpu.memory_space<vmem>>, vector<256x32xbf16>
    %cst = arith.constant dense<0.000000e+00> : vector<2x32xf32>
    %2 = tpu.matmul %0, %1, %cst {dimension_numbers = #tpu.dot_dimension_numbers<[1], [0], [0], [1], [0, 0, 1, 1], [], []>} : vector<2x256xbf16>, vector<256x32xbf16>, vector<2x32xf32> -> vector<2x32xf32>
    %c0_3 = arith.constant 0 : index
    %c0_4 = arith.constant 0 : index
    %3 = vector.load %arg3[%c0_3, %c0_4] : memref<1x32xf32, #tpu.memory_space<vmem>>, vector<1x32xf32>
    %4 = vector.broadcast %3 : vector<1x32xf32> to vector<2x32xf32>
    %5 = arith.addf %2, %4 : vector<2x32xf32>
    %cst_5 = arith.constant 0.000000e+00 : f32
    %6 = vector.broadcast %cst_5 : f32 to vector<2x32xf32>
    %7 = arith.maximumf %5, %6 : vector<2x32xf32>
    %c0_6 = arith.constant 0 : index
    %c0_7 = arith.constant 0 : index
    %8 = vector.load %arg6[%c0_6, %c0_7] : memref<2x32xf32, #tpu.memory_space<vmem>>, vector<2x32xf32>
    tpu.vector_store %arg6[%c0_6, %c0_7], %7 {strides = array<i32>} : memref<2x32xf32, #tpu.memory_space<vmem>>, vector<2x32xf32>,
    %c0_8 = arith.constant 0 : index
    %c0_9 = arith.constant 0 : index
    %9 = vector.load %arg1[%c0_8, %c0_9] : memref<32x16xbf16, #tpu.memory_space<vmem>>, vector<32x16xbf16>
    %c0_10 = arith.constant 0 : index
    %c0_11 = arith.constant 0 : index
    %10 = vector.load %arg4[%c0_10, %c0_11] : memref<16x32xbf16, #tpu.memory_space<vmem>>, vector<16x32xbf16>
    %cst_12 = arith.constant dense<0.000000e+00> : vector<32x32xf32>
    %11 = tpu.matmul %9, %10, %cst_12 {dimension_numbers = #tpu.dot_dimension_numbers<[1], [0], [0], [1], [0, 0, 1, 1], [], []>} : vector<32x16xbf16>, vector<16x32xbf16>, vector<32x32xf32> -> vector<32x32xf32>
    %c0_13 = arith.constant 0 : index
    %c0_14 = arith.constant 0 : index
    %12 = vector.load %arg5[%c0_13, %c0_14] : memref<1x32xf32, #tpu.memory_space<vmem>>, vector<1x32xf32>
    %13 = vector.broadcast %12 : vector<1x32xf32> to vector<32x32xf32>
    %14 = arith.addf %11, %13 : vector<32x32xf32>
    %cst_15 = arith.constant 0.000000e+00 : f32
    %15 = vector.broadcast %cst_15 : f32 to vector<32x32xf32>
    %16 = arith.maximumf %14, %15 : vector<32x32xf32>
    %c0_16 = arith.constant 0 : index
    %c0_17 = arith.constant 0 : index
    %17 = vector.load %arg7[%c0_16, %c0_17] : memref<32x32xf32, #tpu.memory_space<vmem>>, vector<32x32xf32>
    tpu.vector_store %arg7[%c0_16, %c0_17], %16 {strides = array<i32>} : memref<32x32xf32, #tpu.memory_space<vmem>>, vector<32x32xf32>,
    return
  }
}

</mosaic_0001>

<bundles_post_ra>
// kernel: image_encoder_forward.1
= control target key start
LH: loop header
LB: loop body
LE: loop exit
PB: predicated region body
PF: predicated region fallthrough
CT: control target
= control target key end

     0   :  { %13 = vsyncpa [#allocation3], 0  ;;  %vm261_vm0 = vcmask 130048   ;;  %v80_v13 = vlaneseq  ;;  %v483_v18 = vmov 1966171168   ;;  %s622_s0 = inlined_call_operand.vmem [shape: bf16[2,256], index: 0, kind: input, shape index: {}]   ;;  %s623_s1 = inlined_call_operand.vmem [shape: bf16[32,16], index: 1, kind: input, shape index: {}]   ;;  %s624_s2 = inlined_call_operand.vmem [shape: bf16[256,32], index: 2, kind: input, shape index: {}]   ;;  %s625_s3 = inlined_call_operand.vmem [shape: f32[1,32], index: 3, kind: input, shape index: {}]   ;;  %s626_s4 = inlined_call_operand.vmem [shape: bf16[16,32], index: 4, kind: input, shape index: {}]   ;;  %s627_s5 = inlined_call_operand.vmem [shape: f32[1,32], index: 5, kind: input, shape index: {}]   ;;  %s628_s6 = inlined_call_operand.hbm [shape: f32[2,32], index: 6, kind: output, shape index: {0}]   ;;  %s629_s7 = inlined_call_operand.hbm [shape: f32[32,32], index: 7, kind: output, shape index: {1}]  }
   0x1   :  { %v416_v0 = vld [vmem:[%s624_s2 + $0x40] sm:$0xff]   ;;  %v418_v2 = vld [vmem:[%s624_s2 + $0x48] sm:$0xff]   ;;  %v420_v4 = vld [vmem:[%s624_s2 + $0x50] sm:$0xff]   ;;  %v78_v19 = vunpack.c.l.s4 %v483_v18 }
   0x2   :  { %v417_v1 = vld [vmem:[%s624_s2] sm:$0xff]   ;;  %380 = vmatprep.subr.bf16.mxu0 %v416_v0  ;;  %v419_v3 = vld [vmem:[%s624_s2 + $0x8] sm:$0xff]   ;;  %v421_v5 = vld [vmem:[%s624_s2 + $0x10] sm:$0xff]   ;;  %v81_v20 = vshrl.u32 %v80_v13, 7 }
   0x3   :  { %381 = vmatpush3.bf16.msra.mxu0 %v417_v1  ;;  %v422_v6 = vld [vmem:[%s624_s2 + $0x58] sm:$0xff]   ;;  %v424_v8 = vld [vmem:[%s624_s2 + $0x60] sm:$0xff]   ;;  %v426_v11 = vld [vmem:[%s624_s2 + $0x68] sm:$0xff]  }
   0x4   :  { %382 = vmatprep.subr.bf16.mxu0 %v418_v2  ;;  %v423_v7 = vld [vmem:[%s624_s2 + $0x18] sm:$0xff]   ;;  %v425_v9 = vld [vmem:[%s624_s2 + $0x20] sm:$0xff]   ;;  %v427_v14 = vld [vmem:[%s624_s2 + $0x28] sm:$0xff]  }
   0x5   :  { %v430_v10 = vld [vmem:[%s626_s4] sm:$0xff]   ;;  %v434_v15 = vld [vmem:[%s623_s1 + $0x8] sm:$0xff]   ;;  %v428_v17 = vld [vmem:[%s624_s2 + $0x70] sm:$0xff]  }
   0x6   :  { %405 = vmatprep.subr.bf16.mxu1 %v430_v10  ;;  %v432_v12 = vld [vmem:[%s623_s1] sm:$0xff]  }
   0x7   :  { %383 = vmatpush3.bf16.msra.mxu0 %v419_v3  ;;  %406 = vmatpush3.bf16.msra.mxu1 %v430_v10  ;;  %v357_v16 = vld.sshfl [vmem:[%s622_s0] sm:$0x11 pattern:$0x75316420] }
   0x8   :  { %384 = vmatprep.subr.bf16.mxu0 %v420_v4  ;;  %407 = vmatprep.mubr.msk.bf16.mxu1 %vm261_vm0, %v432_v12 }
   0xa   :  { %408 = vmatmul.mubr.msk.bf16.vlgmr.msra.gmra.mrb[0].mxu1 %vm261_vm0, %v434_v15 }
   0xb   :  { %385 = vmatpush3.bf16.msra.mxu0 %v421_v5 }
   0xc   :  { %386 = vmatprep.subr.bf16.mxu0 %v422_v6 }
   0xf   :  { %387 = vmatpush3.bf16.msra.mxu0 %v423_v7 }
  0x10   :  { %388 = vmatprep.subr.bf16.mxu0 %v424_v8 }
  0x13   :  { %389 = vmatpush3.bf16.msra.mxu0 %v425_v9 }
  0x14   :  { %390 = vmatprep.subr.bf16.mxu0 %v426_v11 }
  0x15   :  { %14 = vsyncpa [#allocation5], 0  ;;  %v76_v21 = vcombine.high %v357_v16, %v357_v16  ;;  %v79_v22 = vunpack.c.0.s8 %v78_v19  ;;  %v429_v23 = vld [vmem:[%s624_s2 + $0x30] sm:$0xff]   ;;  %v431_v24 = vld [vmem:[%s624_s2 + $0x78] sm:$0xff]   ;;  %vm321_vm1 = vcmask 261120   ;;  %s484_s17 = smov [#allocation4]  }
  0x16   :  { %v433_v27 = vld [vmem:[%s624_s2 + $0x38] sm:$0xff]   ;;  %v374_v29 = vld [vmem:[%s627_s5] ss:$0 sm:$0xff]  ;;  %s341_s18 = sshll.u32 %s484_s17, 4  ;;  %s342_s18 = int_to_ptr.vmem [resolvable:$true] %s341_s18 }
  0x17   :  { %391 = vmatpush3.bf16.msra.mxu0 %v427_v14  ;;  %v82_v25 = vsub.s32 %v79_v22, %v81_v20  ;;  %s435_s2 = scalar_lea.vmem %s342_s18, 512  ;;  %p440_p1 = scmp.lt.s32.totalorder %s342_s18, %s342_s18 }
  0x18   :  { %392 = vmatprep.subr.bf16.mxu0 %v428_v17  ;;  %p436_p0 = scmp.ne.s32.totalorder %s342_s18, %s435_s2  ;;  %p441_p2 = scmp.lt.s32.totalorder %s435_s2, %s435_s2 }
  0x19   :  { %v90_v26 = vrot.slane %v76_v21, %v82_v25  ;;  %v83_v28 = vrot.slane %v357_v16, %v82_v25 }
  0x1a   :  { %p442_p3 = por %p441_p2, %p440_p1 }
  0x1b   :  { %393 = vmatpush3.bf16.msra.mxu0 %v429_v23  ;;  %221 = vmatprep.mubr.bf16.mxu0 %v90_v26 }
  0x1c   :  { %394 = vmatprep.subr.bf16.mxu0 %v431_v24  ;;  %p443_p4 = pnand %p442_p3, %p436_p0 }
  0x1f   :  { %395 = vmatpush3.bf16.msra.mxu0 %v433_v27 }
  0x22   :  { %222 = vmatmul.mubr.bf16.vlgmr.msra.gmra.mrb[0].mxu0 %v83_v28 }
  0xdd   :  { %v409_v30 = vpop.f32.mrb[0].mxu1 }
  0xde   :  { %v311_v31 = vadd.f32 %v409_v30, %v374_v29  ;;  %v302_v32 = vpop.f32.mrb[1].mxu1 }
  0xdf   :  { %v303_v33 = vadd.f32 %v374_v29, %v302_v32  ;;  %v410_v34 = vpop.f32.mrb[2].mxu1 }
  0xe0   :  { %v319_v35 = vmax.f32 %v311_v31, 0.0  ;;  %v314_v36 = vadd.f32 %v410_v34, %v374_v29  ;;  %v305_v37 = vpop.f32.mrb[3].mxu1 }
  0xe1   :  { %v317_v38 = vmax.f32 %v303_v33, 0.0  ;;  %v306_v39 = vadd.f32 %v374_v29, %v305_v37 }
  0xe2   :  { %324 = vst.msk [vmem:[#allocation4 + $0x10] sm:$0xff] %vm321_vm1, %v319_v35  ;;  %v320_v40 = vmax.f32 %v314_v36, 0.0 }
  0xe3   :  { %322 = vst.msk [vmem:[#allocation4] sm:$0xff] %vm321_vm1, %v317_v38  ;;  %v318_v41 = vmax.f32 %v306_v39, 0.0 }
  0xe4   :  { %325 = vst.msk [vmem:[#allocation4 + $0x18] sm:$0xff] %vm321_vm1, %v320_v40 }
  0xe5   :  { %323 = vst.msk [vmem:[#allocation4 + $0x8] sm:$0xff] %vm321_vm1, %v318_v41 }
  0xe6   :  { %446 = shalt.err (!%p443_p4)
}
  0xe7   :  { %s447_s20 = scalar_lea.hbm %s629_s7, 512 }
  0xe8   :  { %p448_p5 = scmp.ne.s32.totalorder %s629_s7, %s447_s20  ;;  %p451_p6 = scmp.lt.u32.totalorder %s447_s20, %s629_s7 }
  0xea   :  { %p453_p7 = pnand %p451_p6, %p448_p5 }
  0xec   :  { %456 = shalt.err (!%p453_p7)
}
  0xed   :  { %s485_s25 = smov 128   ;;  %s486_s26 = smov 8   ;;  %v356_v43 = vld [vmem:[%s625_s3] ss:$0 sm:$0xff]  ;;  %vm230_vm2 = vcmask 254976  }
  0xee   :  { %347 = dma.vmem_to_hbm [thread:$0]  %s342_s18, 512, %s629_s7, [#allocation5], %s485_s25, %s485_s25, %s486_s26  }
  0xef   :  { %s487_s30 = smov [#allocation2]  }
  0xf0   :  { %s332_s8 = sshll.u32 %s487_s30, 4  ;;  %s333_s8 = int_to_ptr.vmem [resolvable:$true] %s332_s8 }
  0xf1   :  { %s457_s9 = scalar_lea.vmem %s333_s8, 32  ;;  %p462_p9 = scmp.lt.s32.totalorder %s333_s8, %s333_s8 }
  0xf2   :  { %p458_p8 = scmp.ne.s32.totalorder %s333_s8, %s457_s9  ;;  %p463_p10 = scmp.lt.s32.totalorder %s457_s9, %s457_s9 }
  0xf4   :  { %p464_p11 = por %p463_p10, %p462_p9 }
  0xf5   :  { %v396_v42 = vpop.f32.mrb[0].mxu0 }
  0xf6   :  { %v397_v44 = vpop.f32.mrb[1].mxu0  ;;  %p465_p12 = pnand %p464_p11, %p458_p8 }
  0xf7   :  { %v398_v45 = vadd.f32 %v397_v44, %v396_v42  ;;  %v399_v46 = vpop.f32.mrb[2].mxu0 }
  0xf8   :  { %v400_v47 = vpop.f32.mrb[3].mxu0 }
  0xf9   :  { %v224_v48 = vadd.f32 %v398_v45, %v356_v43 }
  0xfb   :  { %v229_v49 = vmax.f32 %v224_v48, 0.0 }
  0xfd   :  { %231 = vst.msk [vmem:[#allocation2] sm:$0x3] %vm230_vm2, %v229_v49 }
  0xfe   :  { %468 = shalt.err (!%p465_p12)
}
  0xff   :  { %s469_s10 = scalar_lea.hbm %s628_s6, 32 }
 0x100   :  { %p470_p13 = scmp.ne.s32.totalorder %s628_s6, %s469_s10  ;;  %p473_p0 = scmp.lt.u32.totalorder %s469_s10, %s628_s6 }
 0x102   :  { %p475_p1 = pnand %p473_p0, %p470_p13 }
 0x104   :  { %478 = shalt.err (!%p475_p1)
}
 0x105   :  { %335 = dma.vmem_to_hbm [thread:$0]  %s333_s8, 32, %s628_s6, [#allocation3]  }
 0x106   :  { %479 = dma.done.wait [#allocation3], 32  }
 0x107   :  { %480 = vsyncadd [#allocation3], 4294967264 }
 0x108   :  { %481 = dma.done.wait [#allocation5], 512  }
 0x109   :  { %482 = vsyncadd [#allocation5], 4294966784 }
 0x10a   :  { %354 = vsyncpa [#allocation3], 1 }
 0x10b   :  { %355 = vsyncpa [#allocation5], 1 }

</bundles_post_ra>
